<compile_context>
chip_gen: v5e
topology: v5e:2x2
jax: 0.10.0
libtpu: 0.0.40
codegen_flags: <defaults>
</compile_context>

<pallas_src>
import functools

import jax
import jax.numpy as jnp
from jax.experimental import pallas as pl
from jax.experimental.pallas import tpu as pltpu


def _round_up(x, m):
    return ((x + m - 1) // m) * m


def _ceil_div(a, b):
    return -(-a // b)


def _proj_head_kernel(x_ref, w1_ref, b1_ref, w2_ref, b2_ref, o_ref, *,
                      bf16_matmul):
    # x_ref:  (C, T)   channels on sublanes, pixels on lanes (batch squeezed).
    # w1_ref: (C, C)   (out, in), eval-BN folded in.
    # b1_ref: (C, 1)
    # w2_ref: (P, C)   (out, in)
    # b2_ref: (P, 1)
    # o_ref:  (P, T)
    x = x_ref[...]
    w1 = w1_ref[...]
    w2 = w2_ref[...]
    if bf16_matmul:
        x = x.astype(jnp.bfloat16)          # weights already bf16 from wrapper

    # Conv1x1 #1 (C -> C) with folded BN, then ReLU (bias/ReLU stay f32).
    h = jnp.dot(w1, x, preferred_element_type=jnp.float32)        # (C, T)
    h = jnp.maximum(h + b1_ref[...], 0.0)
    if bf16_matmul:
        h = h.astype(jnp.bfloat16)

    # Conv1x1 #2 (C -> P).
    y = jnp.dot(w2, h, preferred_element_type=jnp.float32)        # (P, T)
    y = y + b2_ref[...]

    # F.normalize(p=2, dim=channel) over the sublane (P) axis, per lane.
    # y / max(||y||, 1e-12) == y * rsqrt(max(sum(y^2), 1e-24))
    sumsq = jnp.sum(y * y, axis=0, keepdims=True)                 # (1, T)
    inv_norm = jax.lax.rsqrt(jnp.maximum(sumsq, 1e-24))
    o_ref[...] = (y * inv_norm).astype(o_ref.dtype)


@functools.partial(jax.jit, static_argnames=("out_dtype",))
def projection_head(x_nchw, params, out_dtype=jnp.float32):
    """x_nchw: (N, C, H, W) float32. Returns (N, P, H, W) of `out_dtype`."""
    w1, b1 = params["w1"], params["b1"]            # (C, C) [out,in], (C,)
    w2, b2 = params["w2"], params["b2"]            # (P, C) [out,in], (P,)
    gamma, beta = params["gamma"], params["beta"]
    run_mean, run_var = params["running_mean"], params["running_var"]

    # Fold eval-mode BatchNorm into conv1: per-output-channel scale/shift.
    eps = 1e-5
    scale = gamma / jnp.sqrt(run_var + eps)        # (C,)
    shift = beta - run_mean * scale                # (C,)
    w1f = w1 * scale[:, None]                      # (C, C)
    b1f = b1 * scale + shift                       # (C,)

    N, C, H, W = x_nchw.shape
    P = w2.shape[0]
    HW = H * W

    # Zero-copy reshape NCHW -> (N, C, HW); no pad, no output slice.
    x = x_nchw.reshape(N, C, HW)

    # Large dim_in: bf16 MXU matmuls (f32 accumulate) + single-buffered
    # grid-invariant weights.  Both are no-ops at small C (test path).
    bf16_matmul = C >= 256
    single_buffer_weights = C >= 512
    w_dtype = jnp.bfloat16 if bf16_matmul else jnp.float32
    w_itemsize = jnp.dtype(w_dtype).itemsize
    out_itemsize = jnp.dtype(out_dtype).itemsize

    # ---- tile_n from a C-aware VMEM budget --------------------------------
    weight_bufs = 1 if single_buffer_weights else 2
    weight_bytes = ((C * C + P * C) * w_itemsize + 4 * (C + P)) * weight_bufs
    bytes_per_lane = (4 * C * 2                   # double-buffered x tile (f32)
                      + out_itemsize * P * 2      # double-buffered out tile
                      + 4 * (C + P))              # h / y temporaries (f32)
    vmem_budget = 14 << 20                        # under every gen's default scoped VMEM
    tile_n_max = max(128, ((vmem_budget - weight_bytes) // bytes_per_lane)
                     // 128 * 128)
    tile_n_max = min(tile_n_max, 16384)

    # Balance blocks over the pixel axis (so the ragged tail is not mostly
    # padding) and keep >= ~4 grid steps for megacore, without dropping the
    # lane tile below 512 just for that.
    num_blocks = _ceil_div(HW, tile_n_max)
    num_blocks = max(num_blocks,
                     min(_ceil_div(HW, 512), _ceil_div(4, max(N, 1))))
    tile_n = min(_round_up(_ceil_div(HW, num_blocks), 128), tile_n_max)
    grid = (N, _ceil_div(HW, tile_n))

    # Raise scoped VMEM only when the estimate exceeds the smallest default
    # (16 MiB on v5e); stay well under v7x's 64 MiB physical VMEM.
    vmem_est = int(weight_bytes + tile_n * bytes_per_lane)
    vmem_limit = None
    if vmem_est > (14 << 20):
        vmem_limit = int(min(vmem_est + (vmem_est >> 2) + (2 << 20), 48 << 20))

    def _const_spec(shape):
        # Grid-invariant weights/biases; single-buffer at large C.
        if single_buffer_weights:
            return pl.BlockSpec(shape, lambda n, j: (0, 0),
                                pipeline_mode=pl.Buffered(1))
        return pl.BlockSpec(shape, lambda n, j: (0, 0))

    M_total = N * HW
    cost = pl.CostEstimate(
        flops=2 * M_total * C * (C + P),
        transcendentals=M_total,
        bytes_accessed=int(4 * M_total * C + out_itemsize * M_total * P
                           + weight_bytes),
    )

    kernel = functools.partial(_proj_head_kernel, bf16_matmul=bf16_matmul)

    out = pl.pallas_call(
        kernel,
        out_shape=jax.ShapeDtypeStruct((N, P, HW), out_dtype),
        grid_spec=pltpu.PrefetchScalarGridSpec(
            num_scalar_prefetch=0,
            grid=grid,
            in_specs=[
                pl.BlockSpec((None, C, tile_n), lambda n, j: (n, 0, j)),  # x slab
                _const_spec((C, C)),                                      # w1 (BN folded)
                _const_spec((C, 1)),                                      # b1 (BN folded)
                _const_spec((P, C)),                                      # w2
                _const_spec((P, 1)),                                      # b2
            ],
            out_specs=pl.BlockSpec((None, P, tile_n), lambda n, j: (n, 0, j)),
        ),
        compiler_params=pltpu.CompilerParams(
            dimension_semantics=("parallel", "parallel"),
            vmem_limit_bytes=vmem_limit),
        cost_estimate=cost,
    )(
        x,
        w1f.astype(w_dtype), b1f.reshape(C, 1),
        w2.astype(w_dtype), b2.reshape(P, 1),
    )

    # (N, P, HW) -> (N, P, H, W): pure reshape, no transpose, no slice.
    return out.reshape(N, P, H, W)


def init_params(key, dim_in, proj_dim):
    """Parameter init mirroring the PyTorch module's shapes.

    Conv2d(C_in, C_out, kernel_size=1).weight has shape (C_out, C_in, 1, 1);
    we store it squeezed as (C_out, C_in), matching PyTorch's layout.
    """
    k1, k2, k3, k4, k5, k6 = jax.random.split(key, 6)
    w1 = jax.random.normal(k1, (dim_in, dim_in), jnp.float32) * 0.1
    b1 = jax.random.normal(k2, (dim_in,), jnp.float32) * 0.1
    gamma = jnp.ones((dim_in,), jnp.float32) + 0.05 * jax.random.normal(
        k3, (dim_in,), jnp.float32)
    beta = 0.1 * jax.random.normal(k4, (dim_in,), jnp.float32)
    running_mean = 0.1 * jax.random.normal(k5, (dim_in,), jnp.float32)
    running_var = jnp.ones((dim_in,), jnp.float32)
    w2 = jax.random.normal(k6, (proj_dim, dim_in), jnp.float32) * 0.1
    b2 = jnp.zeros((proj_dim,), jnp.float32)
    return dict(w1=w1, b1=b1, gamma=gamma, beta=beta,
                running_mean=running_mean, running_var=running_var,
                w2=w2, b2=b2)


def _reference(x_nchw, params):
    """Plain-JAX reference (eval-mode BN) for a sanity check."""
    eps = 1e-5
    scale = params["gamma"] / jnp.sqrt(params["running_var"] + eps)
    shift = params["beta"] - params["running_mean"] * scale
    N, C, H, W = x_nchw.shape
    x = x_nchw.reshape(N, C, H * W)
    h = jnp.einsum("oc,ncm->nom", params["w1"], x) + params["b1"][None, :, None]
    h = h * scale[None, :, None] + shift[None, :, None]
    h = jnp.maximum(h, 0.0)
    y = jnp.einsum("pc,ncm->npm", params["w2"], h) + params["b2"][None, :, None]
    n = jnp.maximum(jnp.sqrt(jnp.sum(y * y, axis=1, keepdims=True)), 1e-12)
    return (y / n).reshape(N, -1, H, W)


if __name__ == "__main__":
    key = jax.random.PRNGKey(0)
    kx, kx2, kp = jax.random.split(key, 3)

    N, C, H, W = 2, 32, 16, 16       # dim_in = 32
    proj_dim = 64

    params = init_params(kp, C, proj_dim)

    # Case 1: H*W a multiple of 128 lanes (no boundary block).
    x = jax.random.normal(kx, (N, C, H, W), jnp.float32)
    out = jax.block_until_ready(projection_head(x, params))
    ref = _reference(x, params)
    assert out.shape == (N, proj_dim, H, W)
    assert jnp.allclose(out, ref, atol=1e-5, rtol=1e-5)

    # Case 2: ragged spatial size (H*W = 81) -> exercises the masked boundary
    # block path with no wrapper-side pad/slice.
    x2 = jax.random.normal(kx2, (N, C, 9, 9), jnp.float32)
    out2 = jax.block_until_ready(projection_head(x2, params))
    ref2 = _reference(x2, params)
    assert out2.shape == (N, proj_dim, 9, 9)
    assert jnp.allclose(out2, ref2, atol=1e-5, rtol=1e-5)

    print("KERNEL_OK")
</pallas_src>

<mosaic_0001>
module attributes {stable_mosaic.version = 11 : i64} {
  func.func @_proj_head_kernel(%arg0: i32, %arg1: i32, %arg2: memref<1x32x256xf32, #tpu.memory_space<vmem>>, %arg3: memref<32x32xf32, #tpu.memory_space<vmem>>, %arg4: memref<32x1xf32, #tpu.memory_space<vmem>>, %arg5: memref<64x32xf32, #tpu.memory_space<vmem>>, %arg6: memref<64x1xf32, #tpu.memory_space<vmem>>, %arg7: memref<1x64x256xf32, #tpu.memory_space<vmem>>) attributes {dimension_semantics = [#tpu.dimension_semantics<parallel>, #tpu.dimension_semantics<parallel>], iteration_bounds = array<i64: 2, 1>, scalar_prefetch = 0 : i64, scratch_operands = 0 : i64, tpu.core_type = #tpu.core_type<tc>, window_params = [{transform_indices = @transform_0, window_bounds = array<i64: 1, 32, 256>}, {pipeline_mode = #tpu.pipeline_mode<synchronous>, transform_indices = @transform_1, window_bounds = array<i64: 32, 32>}, {pipeline_mode = #tpu.pipeline_mode<synchronous>, transform_indices = @transform_2, window_bounds = array<i64: 32, 1>}, {pipeline_mode = #tpu.pipeline_mode<synchronous>, transform_indices = @transform_3, window_bounds = array<i64: 64, 32>}, {pipeline_mode = #tpu.pipeline_mode<synchronous>, transform_indices = @transform_4, window_bounds = array<i64: 64, 1>}, {transform_indices = @transform_5, window_bounds = array<i64: 1, 64, 256>}]} {
    %c0 = arith.constant 0 : index
    %c0_0 = arith.constant 0 : index
    %c0_1 = arith.constant 0 : index
    %0 = vector.load %arg2[%c0, %c0_0, %c0_1] : memref<1x32x256xf32, #tpu.memory_space<vmem>>, vector<1x32x256xf32>
    %1 = vector.shape_cast %0 : vector<1x32x256xf32> to vector<32x256xf32>
    %c0_2 = arith.constant 0 : index
    %c0_3 = arith.constant 0 : index
    %2 = vector.load %arg3[%c0_2, %c0_3] : memref<32x32xf32, #tpu.memory_space<vmem>>, vector<32x32xf32>
    %c0_4 = arith.constant 0 : index
    %c0_5 = arith.constant 0 : index
    %3 = vector.load %arg5[%c0_4, %c0_5] : memref<64x32xf32, #tpu.memory_space<vmem>>, vector<64x32xf32>
    %cst = arith.constant dense<0.000000e+00> : vector<32x256xf32>
    %4 = tpu.matmul %2, %1, %cst {dimension_numbers = #tpu.dot_dimension_numbers<[1], [0], [0], [1], [0, 0, 1, 1], [], []>} : vector<32x32xf32>, vector<32x256xf32>, vector<32x256xf32> -> vector<32x256xf32>
    %c0_6 = arith.constant 0 : index
    %c0_7 = arith.constant 0 : index
    %5 = vector.load %arg4[%c0_6, %c0_7] : memref<32x1xf32, #tpu.memory_space<vmem>>, vector<32x1xf32>
    %6 = vector.broadcast %5 : vector<32x1xf32> to vector<32x256xf32>
    %7 = arith.addf %4, %6 : vector<32x256xf32>
    %cst_8 = arith.constant 0.000000e+00 : f32
    %8 = vector.broadcast %cst_8 : f32 to vector<32x256xf32>
    %9 = arith.maximumf %7, %8 : vector<32x256xf32>
    %cst_9 = arith.constant dense<0.000000e+00> : vector<64x256xf32>
    %10 = tpu.matmul %3, %9, %cst_9 {dimension_numbers = #tpu.dot_dimension_numbers<[1], [0], [0], [1], [0, 0, 1, 1], [], []>} : vector<64x32xf32>, vector<32x256xf32>, vector<64x256xf32> -> vector<64x256xf32>
    %c0_10 = arith.constant 0 : index
    %c0_11 = arith.constant 0 : index
    %11 = vector.load %arg6[%c0_10, %c0_11] : memref<64x1xf32, #tpu.memory_space<vmem>>, vector<64x1xf32>
    %12 = vector.broadcast %11 : vector<64x1xf32> to vector<64x256xf32>
    %13 = arith.addf %10, %12 : vector<64x256xf32>
    %14 = arith.mulf %13, %13 : vector<64x256xf32>
    %cst_12 = arith.constant dense<0.000000e+00> : vector<256xf32>
    %15 = vector.multi_reduction <add>, %14, %cst_12 [0] : vector<64x256xf32> to vector<256xf32>
    %16 = vector.shape_cast %15 : vector<256xf32> to vector<1x256xf32>
    %cst_13 = arith.constant 1.000000e-24 : f32
    %17 = vector.broadcast %cst_13 : f32 to vector<1x256xf32>
    %18 = arith.maximumf %16, %17 : vector<1x256xf32>
    %19 = math.rsqrt %18 : vector<1x256xf32>
    %20 = vector.broadcast %19 : vector<1x256xf32> to vector<64x256xf32>
    %21 = arith.mulf %13, %20 : vector<64x256xf32>
    %c0_14 = arith.constant 0 : index
    %c0_15 = arith.constant 0 : index
    %c0_16 = arith.constant 0 : index
    %22 = vector.load %arg7[%c0_14, %c0_15, %c0_16] : memref<1x64x256xf32, #tpu.memory_space<vmem>>, vector<1x64x256xf32>
    %23 = vector.shape_cast %22 : vector<1x64x256xf32> to vector<64x256xf32>
    %24 = vector.shape_cast %21 : vector<64x256xf32> to vector<1x64x256xf32>
    tpu.vector_store %arg7[%c0_14, %c0_15, %c0_16], %24 {strides = array<i32>} : memref<1x64x256xf32, #tpu.memory_space<vmem>>, vector<1x64x256xf32>,
    return
  }
  func.func @transform_0(%arg0: i32, %arg1: i32) -> (i32, i32, i32) {
    %c0_i32 = arith.constant 0 : i32
    %c0_i32_0 = arith.constant 0 : i32
    return %arg0, %c0_i32, %arg1 : i32, i32, i32
  }
  func.func @transform_1(%arg0: i32, %arg1: i32) -> (i32, i32) {
    %c0_i32 = arith.constant 0 : i32
    %c0_i32_0 = arith.constant 0 : i32
    %c0_i32_1 = arith.constant 0 : i32
    return %c0_i32, %c0_i32_0 : i32, i32
  }
  func.func @transform_2(%arg0: i32, %arg1: i32) -> (i32, i32) {
    %c0_i32 = arith.constant 0 : i32
    %c0_i32_0 = arith.constant 0 : i32
    %c0_i32_1 = arith.constant 0 : i32
    return %c0_i32, %c0_i32_0 : i32, i32
  }
  func.func @transform_3(%arg0: i32, %arg1: i32) -> (i32, i32) {
    %c0_i32 = arith.constant 0 : i32
    %c0_i32_0 = arith.constant 0 : i32
    %c0_i32_1 = arith.constant 0 : i32
    return %c0_i32, %c0_i32_0 : i32, i32
  }
  func.func @transform_4(%arg0: i32, %arg1: i32) -> (i32, i32) {
    %c0_i32 = arith.constant 0 : i32
    %c0_i32_0 = arith.constant 0 : i32
    %c0_i32_1 = arith.constant 0 : i32
    return %c0_i32, %c0_i32_0 : i32, i32
  }
  func.func @transform_5(%arg0: i32, %arg1: i32) -> (i32, i32, i32) {
    %c0_i32 = arith.constant 0 : i32
    %c0_i32_0 = arith.constant 0 : i32
    return %arg0, %c0_i32, %arg1 : i32, i32, i32
  }
}

</mosaic_0001>

<bundles_post_ra>
// kernel: projection_head.1
= control target key start
LH: loop header
LB: loop body
LE: loop exit
PB: predicated region body
PF: predicated region fallthrough
CT: control target
= control target key end

     0   :  { %s856_s18 = smov 0   ;;  %s858_s19 = smov 0   ;;  %s1082_s0 = inlined_call_operand.vmem [shape: f32[2,32,256], index: 0, kind: input, shape index: {}]   ;;  %s1083_s1 = inlined_call_operand.vmem [shape: f32[32,32], index: 1, kind: input, shape index: {}]   ;;  %s1084_s2 = inlined_call_operand.vmem [shape: f32[32,1], index: 2, kind: input, shape index: {}]   ;;  %s1085_s3 = inlined_call_operand.vmem [shape: f32[64,32], index: 3, kind: input, shape index: {}]   ;;  %s1086_s4 = inlined_call_operand.vmem [shape: f32[64,1], index: 4, kind: input, shape index: {}]   ;;  %s1087_s5 = inlined_call_operand.vmem [shape: f32[2,64,256], index: 5, kind: output, shape index: {}]  }
   0x1   :  { %s860_s20 = smov 0  }
   0x2 LB: > { %s27_s21 = sadd.s32 1, %s819_s19  ;;  %p728_p0 = scmp.ge.s32.totalorder %s823_s20, 1  ;;  %s823_s20 = sphi %s860_s20, %s15_s20   ;;  %s819_s19 = sphi %s858_s19, %s1089_s19   ;;  %s815_s18 = sphi %s856_s18, %s1088_s18  }
   0x3   : > { %p29_p1 = scmp.ge.s32.totalorder %s27_s21, 2  ;;  %p208_p2 = scmp.lt.s32.totalorder %s823_s20, 3 }
   0x5   : > { %s1091_s21 = smov (%p29_p1, %s27_s21), 0  ;;  %p209_p3 = pnand %p728_p0, %p208_p2 }
   0x6   : > { %p245_p4 = scmp.lt.s32.totalorder (!%p209_p3), %s815_s18, 1 }
   0x7   : > { %212 = sbr.rel (%p209_p3) target bundleno = 414 (0x19e), region = 40 }
   0xc   : > { %v285_v0 = vld [vmem:[%s1084_s2 + $0x8] sm:$0xff]  ;;  %v287_v1 = vld [vmem:[%s1084_s2 + $0x18] sm:$0xff]  ;;  %v825_v2 = vmov 0   ;;  %s1093_s18 = smov (!%p245_p4, %s815_s18), 1  ;;  %v284_v7 = vld [vmem:[%s1084_s2] sm:$0xff]  ;;  %vm308_vm0 = vcmask 261120  }
   0xd   : > { %795 = vset.pattern.permute.xlu1 %v825_v2  ;;  %794 = vset.pattern.permute.xlu0 %v825_v2  ;;  %s759_s26 = sshll.u32 %s1093_s18, 6  ;;  %v286_v8 = vld [vmem:[%s1084_s2 + $0x10] sm:$0xff]  ;;  %v272_v13 = vld [vmem:[%s1083_s1] sm:$0xff]  ;;  %v390_v15 = vld [vmem:[%s1086_s4 + $0x18] sm:$0xff]  ;;  %s760_s7 = sshll.u32 %s1093_s18, 7 }
   0xe   : > { %295 = vperm.xlu1 %795, %v285_v0   ;;  %305 = vperm.xlu0 %794, %v287_v1   ;;  %s252_s29 = scalar_lea.vmem %s1082_s0, %s759_s26  ;;  %v389_v14 = vld [vmem:[%s1086_s4 + $0x10] sm:$0xff]  ;;  %v273_v16 = vld [vmem:[%s1083_s1 + $0x8] sm:$0xff]  ;;  %v275_v20 = vld [vmem:[%s1083_s1 + $0x18] sm:$0xff]  ;;  %s1040_s10 = scalar_lea.vmem %s1087_s5, %s760_s7 }
   0xf   : > { %796 = vset.pattern.permute.xlu2 %v825_v2  ;;  %v270_v3 = vld [vmem:[%s252_s29 + $0x30] sm:$0xff]  ;;  %v271_v4 = vld [vmem:[%s252_s29 + $0x38] sm:$0xff]  ;;  %v268_v5 = vld [vmem:[%s252_s29 + $0x20] sm:$0xff] }
  0x10   : > { %333 = vmatpush.msra.mxu0 %v270_v3  ;;  %362 = vmatpush.msra.mxu1 %v271_v4  ;;  %v269_v6 = vld [vmem:[%s252_s29 + $0x28] sm:$0xff]  ;;  %v266_v9 = vld [vmem:[%s252_s29 + $0x10] sm:$0xff]  ;;  %v267_v10 = vld [vmem:[%s252_s29 + $0x18] sm:$0xff] }
  0x11   : > { %v264_v11 = vld [vmem:[%s252_s29] sm:$0xff]  ;;  %v265_v12 = vld [vmem:[%s252_s29 + $0x8] sm:$0xff]  ;;  %v393_v18 = vld [vmem:[%s1086_s4 + $0x30] sm:$0xff] }
  0x12   : > { %334 = vmatpush.msra.mxu0 %v268_v5  ;;  %363 = vmatpush.msra.mxu1 %v269_v6  ;;  %v392_v17 = vld [vmem:[%s1086_s4 + $0x28] sm:$0xff]  ;;  %v274_v19 = vld [vmem:[%s1083_s1 + $0x10] sm:$0xff]  ;;  %v276_v49 = vld [vmem:[%s1085_s3] sm:$0xff] }
  0x13   : > { %v278_v50 = vld [vmem:[%s1085_s3 + $0x10] sm:$0xff]  ;;  %v387_v51 = vld [vmem:[%s1086_s4] sm:$0xff]  ;;  %v277_v52 = vld [vmem:[%s1085_s3 + $0x8] sm:$0xff] }
  0x14   : > { %335 = vmatpush.msra.mxu0 %v266_v9  ;;  %364 = vmatpush.msra.mxu1 %v267_v10  ;;  %v279_v53 = vld [vmem:[%s1085_s3 + $0x18] sm:$0xff]  ;;  %v388_v54 = vld [vmem:[%s1086_s4 + $0x8] sm:$0xff]  ;;  %v280_v55 = vld [vmem:[%s1085_s3 + $0x20] sm:$0xff] }
  0x15   : > { %397 = vperm.xlu2 %796, %v387_v51   ;;  %v391_v56 = vld [vmem:[%s1086_s4 + $0x20] sm:$0xff]  ;;  %v281_v57 = vld [vmem:[%s1085_s3 + $0x28] sm:$0xff]  ;;  %v394_v58 = vld [vmem:[%s1086_s4 + $0x38] sm:$0xff] }
  0x16   : > { %290 = vperm.xlu1 %795, %v284_v7   ;;  %300 = vperm.xlu0 %794, %v286_v8   ;;  %v282_v59 = vld [vmem:[%s1085_s3 + $0x30] sm:$0xff]  ;;  %v283_v60 = vld [vmem:[%s1085_s3 + $0x38] sm:$0xff] }
  0x17   : > { %336 = vmatpush.msra.mxu0 %v264_v11  ;;  %365 = vmatpush.msra.mxu1 %v265_v12 }
  0x18   : > { %733 = vmatmul.msk.f32.vlgmr.msra.gmra.mxu0 %vm308_vm0, %v272_v13  ;;  %737 = vmatmul.msk.f32.vlgmr.msra.gmra.mxu1 %vm308_vm0, %v272_v13 }
  0x1d   : > { %402 = vperm.xlu2 %796, %v388_v54  }
  0x1e   : > { %407 = vperm.xlu0 %794, %v389_v14   ;;  %412 = vperm.xlu1 %795, %v390_v15  }
  0x20   : > { %734 = vmatmul.msk.f32.gmra.mxu0 %vm308_vm0, %v273_v16  ;;  %738 = vmatmul.msk.f32.gmra.mxu1 %vm308_vm0, %v273_v16 }
  0x25   : > { %417 = vperm.xlu2 %796, %v391_v56  }
  0x26   : > { %422 = vperm.xlu0 %794, %v392_v17   ;;  %427 = vperm.xlu1 %795, %v393_v18  }
  0x28   : > { %735 = vmatmul.msk.f32.gmra.mxu0 %vm308_vm0, %v274_v19  ;;  %739 = vmatmul.msk.f32.gmra.mxu1 %vm308_vm0, %v274_v19 }
  0x2d   : > { %432 = vperm.xlu2 %796, %v394_v58  }
  0x30   : > { %736 = vmatmul.msk.f32.gmra.mxu0 %vm308_vm0, %v275_v20  ;;  %740 = vmatmul.msk.f32.gmra.mxu1 %vm308_vm0, %v275_v20 }
  0x6f   : > { %v398_v1 = vpop.permute.xlu2 %397 }
  0x77   : > { %v403_v6 = vpop.permute.xlu2 %402 }
  0x80   : > { %v306_v25 = vpop.permute.xlu0 %305  ;;  %v296_v26 = vpop.permute.xlu1 %295 }
  0x88   : > { %v301_v29 = vpop.permute.xlu0 %300  ;;  %v291_v35 = vpop.permute.xlu1 %290 }
  0x90   : > { %v408_v9 = vpop.permute.xlu0 %407  ;;  %v413_v12 = vpop.permute.xlu1 %412 }
  0x95   : > { %v338_v21 = vpop.f32.mrf.mxu0  ;;  %v367_v22 = vpop.f32.mrf.mxu1 }
  0x96   : > { %v339_v41 = vadd.f32 %v338_v21, %v291_v35  ;;  %v368_v43 = vadd.f32 %v367_v22, %v291_v35 }
  0x98   : > { %v379_v47 = vmax.f32 %v339_v41, 0.0  ;;  %v380_v48 = vmax.f32 %v368_v43, 0.0 }
  0x9d   : > { %v341_v23 = vpop.f32.mrf.mxu0  ;;  %v370_v24 = vpop.f32.mrf.mxu1 }
  0x9e   : > { %v342_v37 = vadd.f32 %v341_v23, %v296_v26  ;;  %v371_v40 = vadd.f32 %v370_v24, %v296_v26  ;;  %v418_v24 = vpop.permute.xlu2 %417 }
  0xa0   : > { %v381_v45 = vmax.f32 %v342_v37, 0.0  ;;  %v382_v46 = vmax.f32 %v371_v40, 0.0 }
  0xa5   : > { %v344_v27 = vpop.f32.mrf.mxu0  ;;  %v373_v28 = vpop.f32.mrf.mxu1 }
  0xa6   : > { %v345_v32 = vadd.f32 %v344_v27, %v301_v29  ;;  %v374_v36 = vadd.f32 %v373_v28, %v301_v29  ;;  %v423_v28 = vpop.permute.xlu0 %422 }
  0xa8   : > { %v383_v42 = vmax.f32 %v345_v32, 0.0  ;;  %v384_v44 = vmax.f32 %v374_v36, 0.0  ;;  %v428_v36 = vpop.permute.xlu1 %427 }
  0xad   : > { %v347_v30 = vpop.f32.mrf.mxu0  ;;  %v376_v31 = vpop.f32.mrf.mxu1 }
  0xae   : > { %v348_v33 = vadd.f32 %v347_v30, %v306_v25  ;;  %v377_v34 = vadd.f32 %v376_v31, %v306_v25 }
  0xb0   : > { %v385_v38 = vmax.f32 %v348_v33, 0.0  ;;  %v386_v39 = vmax.f32 %v377_v34, 0.0 }
  0xb2   : > { %471 = vmatpush.msrb.mxu0 %v385_v38  ;;  %761 = vmatpush.msra.mxu2 %v385_v38 }
  0xb3   : > { %512 = vmatpush.msrb.mxu1 %v386_v39  ;;  %765 = vmatpush.msra.mxu3 %v386_v39 }
  0xb4   : > { %472 = vmatpush.msrb.mxu0 %v383_v42  ;;  %762 = vmatpush.msra.mxu2 %v383_v42 }
  0xb5   : > { %513 = vmatpush.msrb.mxu1 %v384_v44  ;;  %766 = vmatpush.msra.mxu3 %v384_v44 }
  0xb6   : > { %473 = vmatpush.msrb.mxu0 %v381_v45  ;;  %763 = vmatpush.msra.mxu2 %v381_v45 }
  0xb7   : > { %514 = vmatpush.msrb.mxu1 %v382_v46  ;;  %767 = vmatpush.msra.mxu3 %v382_v46 }
  0xb8   : > { %474 = vmatpush.msrb.mxu0 %v379_v47  ;;  %764 = vmatpush.msra.mxu2 %v379_v47 }
  0xb9   : > { %515 = vmatpush.msrb.mxu1 %v380_v48  ;;  %768 = vmatpush.msra.mxu3 %v380_v48 }
  0xba   : > { %741 = vmatmul.msk.f32.vlgmr.msrb.gmra.mxu0 %vm308_vm0, %v276_v49  ;;  %743 = vmatmul.msk.f32.vlgmr.msra.gmra.mxu2 %vm308_vm0, %v278_v50 }
  0xbb   : > { %749 = vmatmul.msk.f32.vlgmr.msrb.gmra.mxu1 %vm308_vm0, %v276_v49  ;;  %751 = vmatmul.msk.f32.vlgmr.msra.gmra.mxu3 %vm308_vm0, %v278_v50 }
  0xc2   : > { %742 = vmatmul.msk.f32.gmra.mxu0 %vm308_vm0, %v277_v52  ;;  %744 = vmatmul.msk.f32.gmra.mxu2 %vm308_vm0, %v279_v53 }
  0xc3   : > { %750 = vmatmul.msk.f32.gmra.mxu1 %vm308_vm0, %v277_v52  ;;  %752 = vmatmul.msk.f32.gmra.mxu3 %vm308_vm0, %v279_v53  ;;  %v433_v52 = vpop.permute.xlu2 %432 }
  0xca   : > { %745 = vmatmul.msk.f32.gmra.mxu2 %vm308_vm0, %v280_v55 }
  0xcb   : > { %753 = vmatmul.msk.f32.gmra.mxu3 %vm308_vm0, %v280_v55 }
  0xd2   : > { %746 = vmatmul.msk.f32.gmra.mxu2 %vm308_vm0, %v281_v57 }
  0xd3   : > { %754 = vmatmul.msk.f32.gmra.mxu3 %vm308_vm0, %v281_v57 }
  0xda   : > { %747 = vmatmul.msk.f32.gmra.mxu2 %vm308_vm0, %v282_v59 }
  0xdb   : > { %755 = vmatmul.msk.f32.gmra.mxu3 %vm308_vm0, %v282_v59 }
  0xe2   : > { %748 = vmatmul.msk.f32.gmra.mxu2 %vm308_vm0, %v283_v60 }
  0xe3   : > { %756 = vmatmul.msk.f32.gmra.mxu3 %vm308_vm0, %v283_v60 }
 0x137   : > { %v476_v2 = vpop.f32.mrf.mxu0 }
 0x138   : > { %v517_v3 = vpop.f32.mrf.mxu1  ;;  %v976_v10 = vadd.f32 %v476_v2, %v398_v1 }
 0x139   : > { %v980_v13 = vadd.f32 %v517_v3, %v398_v1 }
 0x13a   : > { %v541_v17 = vmul.f32 %v976_v10, %v976_v10 }
 0x13b   : > { %v542_v19 = vmul.f32 %v980_v13, %v980_v13 }
 0x13d   : > { %v482_v61 = vpop.f32.mrf.mxu2 }
 0x13e   : > { %v523_v62 = vpop.f32.mrf.mxu3  ;;  %v992_v21 = vadd.f32 %v482_v61, %v408_v9 }
 0x13f   : > { %v479_v7 = vpop.f32.mrf.mxu0  ;;  %v996_v23 = vadd.f32 %v523_v62, %v408_v9 }
 0x140   : > { %v520_v8 = vpop.f32.mrf.mxu1  ;;  %v978_v11 = vadd.f32 %v479_v7, %v403_v6  ;;  %v545_v32 = vmul.f32 %v992_v21, %v992_v21 }
 0x141   : > { %v982_v14 = vadd.f32 %v520_v8, %v403_v6  ;;  %v546_v37 = vmul.f32 %v996_v23, %v996_v23 }
 0x142   : > { %v543_v18 = vmul.f32 %v978_v11, %v978_v11 }
 0x143   : > { %v544_v20 = vmul.f32 %v982_v14, %v982_v14 }
 0x144   : > { %v557_v26 = vadd.f32 %v543_v18, %v541_v17 }
 0x145   : > { %v485_v63 = vpop.f32.mrf.mxu2  ;;  %v570_v29 = vadd.f32 %v544_v20, %v542_v19 }
 0x146   : > { %v526_v0 = vpop.f32.mrf.mxu3  ;;  %v994_v22 = vadd.f32 %v485_v63, %v413_v12  ;;  %v558_v40 = vadd.f32 %v557_v26, %v545_v32 }
 0x147   : > { %v998_v25 = vadd.f32 %v526_v0, %v413_v12  ;;  %v571_v43 = vadd.f32 %v570_v29, %v546_v37 }
 0x148   : > { %v547_v33 = vmul.f32 %v994_v22, %v994_v22 }
 0x149   : > { %v548_v38 = vmul.f32 %v998_v25, %v998_v25 }
 0x14a   : > { %v559_v46 = vadd.f32 %v558_v40, %v547_v33 }
 0x14b   : > { %v572_v48 = vadd.f32 %v571_v43, %v548_v38 }
 0x14d   : > { %v488_v4 = vpop.f32.mrf.mxu2 }
 0x14e   : > { %v529_v5 = vpop.f32.mrf.mxu3  ;;  %v1000_v27 = vadd.f32 %v488_v4, %v418_v24 }
 0x14f   : > { %v1002_v30 = vadd.f32 %v529_v5, %v418_v24 }
 0x150   : > { %v549_v41 = vmul.f32 %v1000_v27, %v1000_v27 }
 0x151   : > { %v550_v44 = vmul.f32 %v1002_v30, %v1002_v30 }
 0x152   : > { %v560_v50 = vadd.f32 %v559_v46, %v549_v41 }
 0x153   : > { %v573_v53 = vadd.f32 %v572_v48, %v550_v44 }
 0x155   : > { %v491_v15 = vpop.f32.mrf.mxu2 }
 0x156   : > { %v532_v16 = vpop.f32.mrf.mxu3  ;;  %v1008_v34 = vadd.f32 %v491_v15, %v423_v28 }
 0x157   : > { %v1014_v39 = vadd.f32 %v532_v16, %v423_v28 }
 0x158   : > { %v551_v47 = vmul.f32 %v1008_v34, %v1008_v34 }
 0x159   : > { %v552_v49 = vmul.f32 %v1014_v39, %v1014_v39 }
 0x15a   : > { %v561_v56 = vadd.f32 %v560_v50, %v551_v47 }
 0x15b   : > { %v574_v59 = vadd.f32 %v573_v53, %v552_v49 }
 0x15d   : > { %v494_v31 = vpop.f32.mrf.mxu2 }
 0x15e   : > { %v535_v35 = vpop.f32.mrf.mxu3  ;;  %v1018_v42 = vadd.f32 %v494_v31, %v428_v36 }
 0x15f   : > { %v1022_v45 = vadd.f32 %v535_v35, %v428_v36 }
 0x160   : > { %v553_v51 = vmul.f32 %v1018_v42, %v1018_v42 }
 0x161   : > { %v554_v54 = vmul.f32 %v1022_v45, %v1022_v45 }
 0x162   : > { %v562_v61 = vadd.f32 %v561_v56, %v553_v51 }
 0x163   : > { %v575_v63 = vadd.f32 %v574_v59, %v554_v54 }
 0x165   : > { %v497_v55 = vpop.f32.mrf.mxu2 }
 0x166   : > { %v498_v57 = vadd.f32 %v497_v55, %v433_v52  ;;  %v538_v58 = vpop.f32.mrf.mxu3 }
 0x167   : > { %v1032_v60 = vadd.f32 %v538_v58, %v433_v52 }
 0x168   : > { %v555_v62 = vmul.f32 %v498_v57, %v498_v57 }
 0x169   : > { %v556_v0 = vmul.f32 %v1032_v60, %v1032_v60 }
 0x16a   : > { %v563_v1 = vadd.f32 %v562_v61, %v555_v62 }
 0x16b   : > { %v576_v2 = vadd.f32 %v575_v63, %v556_v0 }
 0x16c   : > { %v564_v3 = vrot.slane %v563_v1, 4 }
 0x16d   : > { %v577_v4 = vrot.slane %v576_v2, 4 }
 0x16e   : > { %v565_v5 = vadd.f32 %v564_v3, %v563_v1 }
 0x16f   : > { %v578_v6 = vadd.f32 %v577_v4, %v576_v2 }
 0x170   : > { %v566_v7 = vrot.slane %v565_v5, 2 }
 0x171   : > { %v579_v8 = vrot.slane %v578_v6, 2 }
 0x172   : > { %v567_v9 = vadd.f32 %v566_v7, %v565_v5 }
 0x173   : > { %v580_v12 = vadd.f32 %v579_v8, %v578_v6 }
 0x174   : > { %v568_v15 = vrot.slane %v567_v9, 1 }
 0x175   : > { %v581_v16 = vrot.slane %v580_v12, 1 }
 0x176   : > { %v569_v17 = vadd.f32 %v568_v15, %v567_v9 }
 0x177   : > { %v582_v18 = vadd.f32 %v581_v16, %v580_v12 }
 0x178   : > { %v583_v19 = vmax.f32 %v569_v17, 1e-24 }
 0x179   : > { %v584_v20 = vmax.f32 %v582_v18, 1e-24 }
 0x17a   : > { %797 = vrsqrt.f32 %v583_v19  ;;  %vm591_vm2 = vweird.f32 %v583_v19 }
 0x17b   : > { %799 = vrsqrt.f32 %v584_v20  ;;  %vm601_vm5 = vweird.f32 %v584_v20 }
 0x180   : > { %v798_v24 = vpop.eup %797 }
 0x181   : > { %v800_v26 = vpop.eup %799  ;;  %v586_v28 = vmul.f32 %v798_v24, %v583_v19  ;;  %vm592_vm1 = vweird.f32 %v798_v24 }
 0x182   : > { %v596_v29 = vmul.f32 %v800_v26, %v584_v20  ;;  %vm593_vm3 = vmor %vm591_vm2, %vm592_vm1  ;;  %vm602_vm4 = vweird.f32 %v800_v26 }
 0x183   : > { %v587_v31 = vmul.f32 %v798_v24, %v586_v28  ;;  %vm603_vm6 = vmor %vm601_vm5, %vm602_vm4 }
 0x184   : > { %v597_v32 = vmul.f32 %v800_v26, %v596_v29 }
 0x185   : > { %v588_v33 = vmul.f32 0.5, %v587_v31 }
 0x186   : > { %v598_v35 = vmul.f32 0.5, %v597_v32 }
 0x187   : > { %v589_v36 = vsub.f32 1.5, %v588_v33 }
 0x188   : > { %v599_v37 = vsub.f32 1.5, %v598_v35 }
 0x189   : > { %v590_v38 = vmul.f32 %v798_v24, %v589_v36 }
 0x18a   : > { %v600_v41 = vmul.f32 %v800_v26, %v599_v37 }
 0x18b   : > { %v594_v40 = vsel %vm593_vm3, %v798_v24, %v590_v38 }
 0x18c   : > { %v605_v43 = vmul.f32 %v594_v40, %v976_v10  ;;  %v607_v44 = vmul.f32 %v594_v40, %v978_v11  ;;  %v609_v46 = vmul.f32 %v594_v40, %v992_v21  ;;  %v611_v47 = vmul.f32 %v594_v40, %v994_v22 }
 0x18d   : > { %v613_v48 = vmul.f32 %v594_v40, %v1000_v27  ;;  %v615_v49 = vmul.f32 %v594_v40, %v1008_v34  ;;  %v604_v50 = vsel %vm603_vm6, %v800_v26, %v600_v41  ;;  %v617_v10 = vmul.f32 %v594_v40, %v1018_v42 }
 0x18e   : > { %621 = vst [vmem:[%s1040_s10] sm:$0xff] %v605_v43  ;;  %v619_v11 = vmul.f32 %v594_v40, %v498_v57  ;;  %v606_v21 = vmul.f32 %v604_v50, %v980_v13  ;;  %v608_v22 = vmul.f32 %v604_v50, %v982_v14  ;;  %v610_v27 = vmul.f32 %v604_v50, %v996_v23 }
 0x18f   : > { %623 = vst [vmem:[%s1040_s10 + $0x10] sm:$0xff] %v607_v44  ;;  %v612_v34 = vmul.f32 %v604_v50, %v998_v25  ;;  %v614_v42 = vmul.f32 %v604_v50, %v1002_v30  ;;  %v616_v51 = vmul.f32 %v604_v50, %v1014_v39  ;;  %v618_v13 = vmul.f32 %v604_v50, %v1022_v45 }
 0x190   : > { %625 = vst [vmem:[%s1040_s10 + $0x20] sm:$0xff] %v609_v46  ;;  %v620_v52 = vmul.f32 %v604_v50, %v1032_v60 }
 0x191   : > { %627 = vst [vmem:[%s1040_s10 + $0x30] sm:$0xff] %v611_v47 }
 0x192   : > { %629 = vst [vmem:[%s1040_s10 + $0x40] sm:$0xff] %v613_v48 }
 0x193   : > { %631 = vst [vmem:[%s1040_s10 + $0x50] sm:$0xff] %v615_v49 }
 0x194   : > { %633 = vst [vmem:[%s1040_s10 + $0x60] sm:$0xff] %v617_v10 }
 0x195   : > { %635 = vst [vmem:[%s1040_s10 + $0x70] sm:$0xff] %v619_v11 }
 0x196   : > { %622 = vst [vmem:[%s1040_s10 + $0x8] sm:$0xff] %v606_v21 }
 0x197   : > { %624 = vst [vmem:[%s1040_s10 + $0x18] sm:$0xff] %v608_v22 }
 0x198   : > { %626 = vst [vmem:[%s1040_s10 + $0x28] sm:$0xff] %v610_v27 }
 0x199   : > { %628 = vst [vmem:[%s1040_s10 + $0x38] sm:$0xff] %v612_v34 }
 0x19a   : > { %630 = vst [vmem:[%s1040_s10 + $0x48] sm:$0xff] %v614_v42 }
 0x19b   : > { %632 = vst [vmem:[%s1040_s10 + $0x58] sm:$0xff] %v616_v51 }
 0x19c   : > { %634 = vst [vmem:[%s1040_s10 + $0x68] sm:$0xff] %v618_v13 }
 0x19d   : > { %636 = vst [vmem:[%s1040_s10 + $0x78] sm:$0xff] %v620_v52 }
 0x19e PF: > { %s15_s20 = sadd.s32 1, %s823_s20   ;;  %s1088_s18 = smov %s819_s19 }
 0x19f   : > { %p12_p5 = scmp.ge.s32.totalorder %s15_s20, 4   ;;  %s1089_s19 = smov %s1091_s21 }
 0x1a1   :  { %14 = sbr.rel (!%p12_p5) target bundleno = 2 (0x2), region = 70 }

</bundles_post_ra>
